<compile_context>
chip_gen: v6e
topology: v6e:2x2x1
jax: 0.10.0
libtpu: 0.0.40
codegen_flags: <defaults>
</compile_context>

<pallas_src>
import math

import jax
import jax.numpy as jnp
from jax.experimental import pallas as pl
from jax.experimental.pallas import tpu as pltpu

_LANES = 128
_SUBLANES = 8
_SINGLE_BLOCK_BYTES = 6 << 20   # one full-extent block below this output size
_TILE_TARGET_BYTES = 4 << 20    # per-tile output bytes when tiling large B


def _sinusoidal_kernel(x_ref, f_ref, p_ref, o_ref):
    # x_ref: (tr, 1) timesteps column (direct path) or (tr, 128) lane-expanded
    #        timesteps (packed path).
    # f_ref: (1, W)  frequency row  ([freqs, freqs], tiled k times if packed)
    # p_ref: (1, W)  phase row      ([0...0, pi/2...pi/2], tiled if packed)
    # o_ref: (tr, W) output block;  out = sin(x * f + p)  (cos == sin(+pi/2))
    x = x_ref[...].astype(jnp.float32)
    arg = x * f_ref[...] + p_ref[...]
    o_ref[...] = jnp.sin(arg).astype(o_ref.dtype)


def _pick_rows_tile(n_rows, row_bytes):
    """Rows per block: full extent for small outputs, else ~4 MiB tiles that
    are a multiple of 8 sublanes (caller pads n_rows up to a multiple)."""
    if n_rows * row_bytes <= _SINGLE_BLOCK_BYTES:
        return n_rows
    tr = (_TILE_TARGET_BYTES // max(row_bytes, 1)) // _SUBLANES * _SUBLANES
    tr = max(_SUBLANES, tr)
    return min(tr, n_rows)


def sinusoidal_pos_emb(x, dim, theta=10000.0, out_dtype=jnp.float32):
    """x: (B,) timesteps. Returns (B, dim) embedding in `out_dtype`."""
    assert dim % 2 == 0 and dim >= 4, "dim must be an even integer >= 4"
    B = x.shape[0]
    half = dim // 2

    # Precompute the frequency / phase tables in the wrapper (O(dim)).
    scale = -math.log(theta) / (half - 1)
    freqs = jnp.exp(jnp.arange(half, dtype=jnp.float32) * scale)          # (half,)
    f_row = jnp.concatenate([freqs, freqs])                               # (dim,)
    p_row = jnp.concatenate([jnp.zeros((half,), jnp.float32),
                             jnp.full((half,), 0.5 * math.pi, jnp.float32)])

    out_bytes = jnp.dtype(out_dtype).itemsize
    xf = x.astype(jnp.float32)

    packed = (dim < _LANES) and (_LANES % dim == 0)
    if packed:
        # Fold k batch rows into each 128-lane output row -> unmasked stores.
        k = _LANES // dim
        W = _LANES
        rows = pl.cdiv(B, k)
        tr = _pick_rows_tile(rows, W * out_bytes)
        if tr < rows:
            rows = pl.cdiv(rows, tr) * tr
        b_pad = rows * k
        if b_pad != B:
            xf = jnp.pad(xf, (0, b_pad - B))
        # Lane-expand x so each lane already carries its timestep (no
        # cross-lane work inside the kernel).
        x_in = jnp.repeat(xf.reshape(rows, k), dim, axis=1)               # (rows, 128)
        f_in = jnp.tile(f_row, (k,)).reshape(1, W)
        p_in = jnp.tile(p_row, (k,)).reshape(1, W)
        x_block = (tr, W)
    else:
        W = dim
        rows = B
        tr = _pick_rows_tile(rows, W * out_bytes)
        if tr < rows:
            rows = pl.cdiv(rows, tr) * tr
        b_pad = rows
        if b_pad != B:
            xf = jnp.pad(xf, (0, b_pad - B))
        x_in = xf.reshape(rows, 1)
        f_in = f_row.reshape(1, W)
        p_in = p_row.reshape(1, W)
        x_block = (tr, 1)

    grid = (rows // tr,)

    out = pl.pallas_call(
        _sinusoidal_kernel,
        out_shape=jax.ShapeDtypeStruct((rows, W), out_dtype),
        grid_spec=pltpu.PrefetchScalarGridSpec(
            num_scalar_prefetch=0,
            grid=grid,
            in_specs=[
                pl.BlockSpec(x_block, lambda i: (i, 0)),
                pl.BlockSpec((1, W), lambda i: (0, 0)),
                pl.BlockSpec((1, W), lambda i: (0, 0)),
            ],
            out_specs=pl.BlockSpec((tr, W), lambda i: (i, 0)),
        ),
        compiler_params=pltpu.CompilerParams(
            dimension_semantics=("parallel",),
            vmem_limit_bytes=32 * 1024 * 1024,
        ),
    )(x_in, f_in, p_in)

    # Packed layout unpacks with a free contiguous reshape; slice off padding.
    out = out.reshape(b_pad, dim)
    if b_pad != B:
        out = out[:B]
    return out


def sinusoidal_pos_emb_ref(x, dim, theta=10000.0):
    # Pure-JAX reference mirroring the PyTorch forward.
    half = dim // 2
    scale = -math.log(theta) / (half - 1)
    freqs = jnp.exp(jnp.arange(half, dtype=jnp.float32) * scale)
    emb = x.astype(jnp.float32)[:, None] * freqs[None, :]
    return jnp.concatenate([jnp.sin(emb), jnp.cos(emb)], axis=-1)


if __name__ == "__main__":
    key = jax.random.PRNGKey(0)
    # (B, dim) cases: packed lane-dense path, packed path needing row padding,
    # and the direct (dim >= 128) path.
    cases = [(8, 32), (10, 32), (6, 256)]
    for B, dim in cases:
        kx, key = jax.random.split(key)
        x = jax.random.uniform(kx, (B,), jnp.float32, minval=0.0, maxval=1000.0)
        out = jax.block_until_ready(sinusoidal_pos_emb(x, dim))
        ref = sinusoidal_pos_emb_ref(x, dim)
        assert out.shape == (B, dim) and out.dtype == jnp.float32
        err = float(jnp.abs(out - ref).max())
        assert jnp.allclose(out, ref, atol=2e-3, rtol=1e-4), (B, dim, err)

    # bf16 output path: sin evaluated in f32, cast only at the store.
    kx, key = jax.random.split(key)
    x = jax.random.uniform(kx, (8,), jnp.float32, minval=0.0, maxval=1000.0)
    out_bf16 = jax.block_until_ready(
        sinusoidal_pos_emb(x, 64, out_dtype=jnp.bfloat16))
    assert out_bf16.shape == (8, 64) and out_bf16.dtype == jnp.bfloat16
    assert jnp.allclose(out_bf16.astype(jnp.float32),
                        sinusoidal_pos_emb_ref(x, 64), atol=2e-2)

    print("KERNEL_OK")
</pallas_src>

<mosaic_0001>
module attributes {stable_mosaic.version = 11 : i64} {
  func.func @_sinusoidal_kernel(%arg0: i32, %arg1: memref<2x128xf32, #tpu.memory_space<vmem>>, %arg2: memref<1x128xf32, #tpu.memory_space<vmem>>, %arg3: memref<1x128xf32, #tpu.memory_space<vmem>>, %arg4: memref<2x128xf32, #tpu.memory_space<vmem>>) attributes {dimension_semantics = [#tpu.dimension_semantics<parallel>], iteration_bounds = array<i64: 1>, scalar_prefetch = 0 : i64, scratch_operands = 0 : i64, tpu.core_type = #tpu.core_type<tc>, window_params = [{transform_indices = @transform_0, window_bounds = array<i64: 2, 128>}, {pipeline_mode = #tpu.pipeline_mode<synchronous>, transform_indices = @transform_1, window_bounds = array<i64: 1, 128>}, {pipeline_mode = #tpu.pipeline_mode<synchronous>, transform_indices = @transform_2, window_bounds = array<i64: 1, 128>}, {transform_indices = @transform_3, window_bounds = array<i64: 2, 128>}]} {
    %c0 = arith.constant 0 : index
    %c0_0 = arith.constant 0 : index
    %0 = vector.load %arg1[%c0, %c0_0] : memref<2x128xf32, #tpu.memory_space<vmem>>, vector<2x128xf32>
    %c0_1 = arith.constant 0 : index
    %c0_2 = arith.constant 0 : index
    %1 = vector.load %arg2[%c0_1, %c0_2] : memref<1x128xf32, #tpu.memory_space<vmem>>, vector<1x128xf32>
    %2 = vector.broadcast %1 : vector<1x128xf32> to vector<2x128xf32>
    %3 = arith.mulf %0, %2 : vector<2x128xf32>
    %c0_3 = arith.constant 0 : index
    %c0_4 = arith.constant 0 : index
    %4 = vector.load %arg3[%c0_3, %c0_4] : memref<1x128xf32, #tpu.memory_space<vmem>>, vector<1x128xf32>
    %5 = vector.broadcast %4 : vector<1x128xf32> to vector<2x128xf32>
    %6 = arith.addf %3, %5 : vector<2x128xf32>
    %7 = math.sin %6 : vector<2x128xf32>
    %c0_5 = arith.constant 0 : index
    %c0_6 = arith.constant 0 : index
    %8 = vector.load %arg4[%c0_5, %c0_6] : memref<2x128xf32, #tpu.memory_space<vmem>>, vector<2x128xf32>
    tpu.vector_store %arg4[%c0_5, %c0_6], %7 {strides = array<i32>} : memref<2x128xf32, #tpu.memory_space<vmem>>, vector<2x128xf32>,
    return
  }
  func.func @transform_0(%arg0: i32) -> (i32, i32) {
    %c0_i32 = arith.constant 0 : i32
    %c0_i32_0 = arith.constant 0 : i32
    return %arg0, %c0_i32 : i32, i32
  }
  func.func @transform_1(%arg0: i32) -> (i32, i32) {
    %c0_i32 = arith.constant 0 : i32
    %c0_i32_0 = arith.constant 0 : i32
    %c0_i32_1 = arith.constant 0 : i32
    return %c0_i32, %c0_i32_0 : i32, i32
  }
  func.func @transform_2(%arg0: i32) -> (i32, i32) {
    %c0_i32 = arith.constant 0 : i32
    %c0_i32_0 = arith.constant 0 : i32
    %c0_i32_1 = arith.constant 0 : i32
    return %c0_i32, %c0_i32_0 : i32, i32
  }
  func.func @transform_3(%arg0: i32) -> (i32, i32) {
    %c0_i32 = arith.constant 0 : i32
    %c0_i32_0 = arith.constant 0 : i32
    return %arg0, %c0_i32 : i32, i32
  }
}

</mosaic_0001>

<bundles_post_ra>
// kernel: tpu_custom_call.1
= control target key start
LH: loop header
LB: loop body
LE: loop exit
PB: predicated region body
PF: predicated region fallthrough
CT: control target
= control target key end

     0   :  { %8 = vsyncpa [#allocation3], 0  ;;  %s291_s0 = inlined_call_operand.hbm [shape: f32[2,128], index: 0, kind: input, shape index: {}]   ;;  %s292_s1 = inlined_call_operand.vmem [shape: f32[1,128], index: 1, kind: input, shape index: {}]   ;;  %s293_s2 = inlined_call_operand.vmem [shape: f32[1,128], index: 2, kind: input, shape index: {}]   ;;  %s294_s3 = inlined_call_operand.hbm [shape: f32[2,128], index: 3, kind: output, shape index: {}]  }
   0x1   :  { %9 = vsyncpa [#allocation4], 0  ;;  %s230_s12 = smov [#allocation2]  }
   0x2   :  { %s16_s13 = sshll.u32 %s230_s12, 4  ;;  %s17_s13 = int_to_ptr.vmem [resolvable:$true] %s16_s13 }
   0x3   :  { %s194_s14 = scalar_lea.vmem %s17_s13, 32  ;;  %p199_p1 = scmp.lt.s32.totalorder %s17_s13, %s17_s13 }
   0x4   :  { %p195_p0 = scmp.ne.s32.totalorder %s17_s13, %s194_s14  ;;  %p200_p2 = scmp.lt.s32.totalorder %s194_s14, %s194_s14 }
   0x6   :  { %p201_p3 = por %p200_p2, %p199_p1 }
   0x8   :  { %p202_p4 = pnand %p201_p3, %p195_p0 }
   0xa   :  { %205 = shalt.err (!%p202_p4)
}
   0xb   :  { %19 = dma.hbm_to_vmem [thread:$0]  %s291_s0, 32, %s17_s13, [#allocation3]  }
   0xc   :  { %226 = dma.done.wait [#allocation3], 32  }
   0xd   :  { %227 = vsyncadd [#allocation3], 4294967264  ;;  %v27_v0 = vld [vmem:[#allocation2] sm:$0x3]  ;;  %v231_v16 = vmov 683565275  }
   0xe   :  { %v164_v1 = vld [vmem:[%s292_s1] ss:$0 sm:$0xff]  ;;  %v232_v18 = vmov 2475754826   ;;  %v233_v20 = vmov 2131351028  }
   0xf   :  { %v165_v2 = vld [vmem:[%s293_s2] ss:$0 sm:$0xff]  ;;  %v35_v3 = vmul.f32 %v164_v1, %v27_v0  ;;  %v234_v22 = vmov 2102212464   ;;  %v235_v24 = vmov 920167782  }
  0x10   :  { %v236_v31 = vmov 1326507024   ;;  %s237_s0 = smov [#allocation5]  }
  0x11   :  { %v267_v4 = vadd.f32 %v165_v2, %v35_v3  ;;  %s155_s1 = sshll.u32 %s237_s0, 4  ;;  %s156_s1 = int_to_ptr.vmem [resolvable:$true] %s155_s1 }
  0x12   :  { %s206_s2 = scalar_lea.vmem %s156_s1, 32  ;;  %p211_p6 = scmp.lt.s32.totalorder %s156_s1, %s156_s1 }
  0x13   :  { %v47_v5 = vand.u32 2139095040, %v267_v4  ;;  %v44_v7 = vand.u32 2147483647, %v267_v4  ;;  %vm46_vm7 = vcmp.lt.s32.totalorder %v267_v4, 0  ;;  %vm136_vm12 = vweird.f32 %v267_v4  ;;  %p207_p5 = scmp.ne.s32.totalorder %s156_s1, %s206_s2  ;;  %p212_p7 = scmp.lt.s32.totalorder %s206_s2, %s206_s2 }
  0x15   :  { %v48_v6 = vshrl.u32 %v47_v5, 23  ;;  %v51_v10 = vand.u32 8388607, %v44_v7  ;;  %vm45_vm8 = vcmp.le.f32.partialorder %v44_v7, 0.7853982  ;;  %p213_p8 = por %p212_p7, %p211_p6 }
  0x17   :  { %v166_v8 = vadd.s32 4294967169, %v48_v6  ;;  %v52_v13 = vor.u32 8388608, %v51_v10  ;;  %p214_p9 = pnand %p213_p8, %p207_p5 }
  0x19   :  { %v54_v9 = vadd.s32 1, %v166_v8  ;;  %v92_v33 = vshll.u32 %v52_v13, 8 }
  0x1b   :  { %vm55_vm0 = vcmp.gt.s32.totalorder %v54_v9, 0 }
  0x1c   :  { %v56_v11 = vsel %vm55_vm0, %v54_v9, 0 }
  0x1d   :  { %v58_v12 = vand.u32 31, %v56_v11  ;;  %v57_v14 = vshrl.u32 %v56_v11, 5 }
  0x1f   :  { %v59_v15 = vsub.s32 32, %v58_v12  ;;  %v61_v17 = vshll.u32 %v231_v16, %v58_v12  ;;  %v64_v19 = vshll.u32 %v232_v18, %v58_v12  ;;  %v67_v21 = vshll.u32 %v233_v20, %v58_v12 }
  0x20   :  { %v70_v23 = vshll.u32 %v234_v22, %v58_v12  ;;  %v73_v25 = vshll.u32 %v235_v24, %v58_v12  ;;  %vm76_vm1 = vcmp.lt.s32.totalorder %v57_v14, 1  ;;  %vm79_vm2 = vcmp.lt.s32.totalorder %v57_v14, 4 }
  0x21   :  { %v60_v26 = vshrl.u32 %v231_v16, %v59_v15  ;;  %v62_v27 = vshrl.u32 %v232_v18, %v59_v15  ;;  %v65_v28 = vshrl.u32 %v233_v20, %v59_v15  ;;  %v68_v29 = vshrl.u32 %v234_v22, %v59_v15 }
  0x22   :  { %v71_v30 = vshrl.u32 %v235_v24, %v59_v15  ;;  %v74_v32 = vshrl.u32 %v236_v31, %v59_v15  ;;  %vm77_vm3 = vcmp.lt.s32.totalorder %v57_v14, 2  ;;  %vm78_vm4 = vcmp.lt.s32.totalorder %v57_v14, 3 }
  0x23   :  { %v63_v34 = vor.u32 %v62_v27, %v61_v17  ;;  %v66_v35 = vor.u32 %v65_v28, %v64_v19  ;;  %v69_v36 = vor.u32 %v68_v29, %v67_v21 }
  0x24   :  { %v72_v37 = vor.u32 %v71_v30, %v70_v23  ;;  %v75_v38 = vor.u32 %v74_v32, %v73_v25 }
  0x25   :  { %v80_v39 = vsel %vm76_vm1, %v60_v26, %v63_v34  ;;  %v81_v40 = vsel %vm79_vm2, %v69_v36, 2102212464  ;;  %v84_v41 = vsel %vm76_vm1, %v63_v34, %v66_v35  ;;  %v88_v42 = vsel %vm76_vm1, %v66_v35, %v69_v36 }
  0x26   :  { %v82_v43 = vsel %vm78_vm4, %v66_v35, %v81_v40  ;;  %v85_v44 = vsel %vm79_vm2, %v72_v37, 920167782  ;;  %v89_v45 = vsel %vm79_vm2, %v75_v38, 1326507024 }
  0x27   :  { %v86_v46 = vsel %vm78_vm4, %v69_v36, %v85_v44  ;;  %v90_v47 = vsel %vm78_vm4, %v72_v37, %v89_v45  ;;  %v83_v48 = vsel %vm77_vm3, %v80_v39, %v82_v43 }
  0x28   :  { %v87_v49 = vsel %vm77_vm3, %v84_v41, %v86_v46  ;;  %v91_v50 = vsel %vm77_vm3, %v88_v42, %v90_v47  ;;  %v99_v55 = vmul.u32 %v92_v33, %v83_v48 }
  0x29   :  { %v273_v51 = vmul.u32.u64.low %v92_v33, %v91_v50  ;;  %v274_v52 = vmul.u32.u64.high %v92_v33, %v91_v50, %v273_v51  ;;  %v276_v53 = vmul.u32.u64.low %v92_v33, %v87_v49  ;;  %v277_v54 = vmul.u32.u64.high %v92_v33, %v87_v49, %v276_v53 }
  0x2b   :  { %vm101_vm5 = vc.u32 %v274_v52, %v276_v53  ;;  %v102_v56 = vadd.s32 1, %v277_v54  ;;  %v100_v3 = vadd.s32 %v276_v53, %v274_v52 }
  0x2d   :  { %v103_v57 = vsel %vm101_vm5, %v102_v56, %v277_v54 }
  0x2e   :  { %v104_v58 = vadd.s32 %v103_v57, %v99_v55 }
  0x30   :  { %v105_v59 = vadd.s32 536870912, %v104_v58 }
  0x32   :  { %v106_v60 = vshrl.u32 %v105_v59, 30 }
  0x34   :  { %v107_v61 = vshll.u32 %v106_v60, 30  ;;  %v130_v18 = vsub.s32 4, %v106_v60 }
  0x36   :  { %v108_v62 = vsub.s32 %v104_v58, %v107_v61  ;;  %v131_v21 = vsel %vm46_vm7, %v130_v18, %v106_v60 }
  0x37   :  { %v133_v23 = vsel %vm45_vm8, 0, %v131_v21 }
  0x38   :  { %v110_v63 = vsub.s32 0, %v108_v62  ;;  %v137_v24 = vadd.s32 3, %v133_v23 }
  0x3a   :  { %v167_v0 = vmin.u32 %v110_v63, %v108_v62  ;;  %v138_v25 = vand.u32 3, %v137_v24 }
  0x3c   :  { %v112_v1 = vclz %v167_v0  ;;  %vm143_vm9 = vcmp.eq.s32.totalorder %v138_v25, 2  ;;  %vm140_vm10 = vcmp.eq.s32.totalorder %v138_v25, 0  ;;  %vm139_vm11 = vcmp.lt.s32.totalorder %v138_v25, 2 }
  0x3e   :  { %v168_v2 = vadd.s32 4294967294, %v112_v1 }
  0x40   :  { %vm169_vm6 = vcmp.lt.s32.totalorder %v168_v2, 0 }
  0x41   :  { %v115_v5 = vsel %vm169_vm6, 0, %v168_v2 }
  0x42   :  { %v116_v6 = vsub.s32 32, %v115_v5  ;;  %v117_v8 = vshll.u32 %v108_v62, %v115_v5  ;;  %v120_v9 = vsub.s32 4294967266, %v115_v5 }
  0x44   :  { %v118_v10 = vshrl.u32 %v100_v3, %v116_v6  ;;  %v121_v11 = vadd.s32 127, %v120_v9 }
  0x46   :  { %v119_v12 = vor.u32 %v118_v10, %v117_v8  ;;  %v122_v13 = vshll.u32 %v121_v11, 23 }
  0x48   :  { %v123_v14 = vor.u32 4788187, %v122_v13  ;;  %v126_v15 = vcvt.s32.f32 %v119_v12 }
  0x4a   :  { %v124_v16 = vand.u32 2147483647, %v123_v14 }
  0x4c   :  { %v127_v17 = vmul.f32 %v126_v15, %v124_v16 }
  0x4e   :  { %v128_v19 = vxor.u32 2147483648, %v127_v17 }
  0x50   :  { %v129_v20 = vsel %vm46_vm7, %v128_v19, %v127_v17 }
  0x51   :  { %v132_v22 = vsel %vm45_vm8, %v267_v4, %v129_v20 }
  0x52   :  { %182 = vcosq.f32 %v132_v22 }
  0x53   :  { %184 = vsinq.f32 %v132_v22 }
  0x5f   :  { %v183_v26 = vpop.eup %182 }
  0x60   :  { %v185_v27 = vpop.eup %184  ;;  %v144_v28 = vxor.u32 2147483648, %v183_v26 }
  0x61   :  { %v141_v29 = vxor.u32 2147483648, %v185_v27 }
  0x62   :  { %v145_v7 = vsel %vm143_vm9, %v144_v28, %v185_v27 }
  0x63   :  { %v142_v30 = vsel %vm140_vm10, %v183_v26, %v141_v29 }
  0x64   :  { %v146_v31 = vsel %vm139_vm11, %v142_v30, %v145_v7 }
  0x65   :  { %v147_v32 = vsel %vm136_vm12, nan, %v146_v31 }
  0x66   :  { %148 = vst [vmem:[#allocation5] sm:$0x3] %v147_v32 }
  0x67   :  { %217 = shalt.err (!%p214_p9)
}
  0x68   :  { %158 = dma.vmem_to_hbm [thread:$0]  %s156_s1, 32, %s294_s3, [#allocation4]  }
  0x69   :  { %228 = dma.done.wait [#allocation4], 32  }
  0x6a   :  { %229 = vsyncadd [#allocation4], 4294967264 }
  0x6b   :  { %162 = vsyncpa [#allocation3], 1 }
  0x6c   :  { %163 = vsyncpa [#allocation4], 1 }

</bundles_post_ra>
